<compile_context>
chip_gen: v7x
topology: tpu7x:2x2x1
jax: 0.10.0
libtpu: 0.0.40
codegen_flags: <defaults>
</compile_context>

<pallas_src>
import functools

import jax
import jax.numpy as jnp
from jax.experimental import pallas as pl
from jax.experimental.pallas import tpu as pltpu

LANE = 128        # vreg lane width / MXU edge
BATCH_TILE = 128  # rows of x processed per grid step


def _pad2d(a, rows, cols):
    r, c = a.shape
    return jnp.pad(a, ((0, rows - r), (0, cols - c)))


def mlp_kernel(x_ref, w1_ref, b1_ref, w2_ref, b2_ref, w3_ref, b3_ref, o_ref):
    """relu(relu(x@W1+b1)@W2+b2)@W3+b3 on one lane-dense batch tile.

    Matmuls: bf16 inputs, f32 accumulation on the MXU.
    Bias-add / ReLU: f32 on the VPU.
    """
    x = x_ref[...]                                                  # bf16
    h1 = jnp.dot(x, w1_ref[...], preferred_element_type=jnp.float32) + b1_ref[...]
    h1 = jnp.maximum(h1, 0.0).astype(jnp.bfloat16)
    h2 = jnp.dot(h1, w2_ref[...], preferred_element_type=jnp.float32) + b2_ref[...]
    h2 = jnp.maximum(h2, 0.0).astype(jnp.bfloat16)
    out = jnp.dot(h2, w3_ref[...], preferred_element_type=jnp.float32) + b3_ref[...]
    o_ref[...] = out.astype(o_ref.dtype)


def prepare_params(w1, b1, w2, b2, w3, b3):
    """One-time lane-dense padding + bf16 cast of the parameters (JAX glue)."""
    def pad_w(w):
        pr = pl.cdiv(w.shape[0], LANE) * LANE
        pc = pl.cdiv(w.shape[1], LANE) * LANE
        return _pad2d(w, pr, pc).astype(jnp.bfloat16)

    def pad_b(b):
        pc = pl.cdiv(b.shape[1], LANE) * LANE
        return _pad2d(b, 1, pc).astype(jnp.float32)

    return (pad_w(w1), pad_b(b1), pad_w(w2), pad_b(b2), pad_w(w3), pad_b(b3))


@functools.partial(jax.jit, static_argnames=("output_size",))
def neural_network_forward(x, w1p, b1p, w2p, b2p, w3p, b3p, *, output_size):
    batch, in_features = x.shape
    in_padded = w1p.shape[0]
    out_padded = w3p.shape[1]

    # Pad batch up to a whole number of tiles and features up to the padded
    # weight width; cast activations to bf16 for the MXU.
    batch_padded = pl.cdiv(batch, BATCH_TILE) * BATCH_TILE
    xp = _pad2d(x, batch_padded, in_padded).astype(jnp.bfloat16)

    grid = (batch_padded // BATCH_TILE,)

    x_spec = pl.BlockSpec((BATCH_TILE, in_padded), lambda i: (i, 0))
    out_spec = pl.BlockSpec((BATCH_TILE, out_padded), lambda i: (i, 0))
    # Weights/biases: constant block index -> fetched once, resident in VMEM.
    w1s = pl.BlockSpec(w1p.shape, lambda i: (0, 0))
    b1s = pl.BlockSpec(b1p.shape, lambda i: (0, 0))
    w2s = pl.BlockSpec(w2p.shape, lambda i: (0, 0))
    b2s = pl.BlockSpec(b2p.shape, lambda i: (0, 0))
    w3s = pl.BlockSpec(w3p.shape, lambda i: (0, 0))
    b3s = pl.BlockSpec(b3p.shape, lambda i: (0, 0))

    out_pad = pl.pallas_call(
        mlp_kernel,
        out_shape=jax.ShapeDtypeStruct((batch_padded, out_padded), jnp.float32),
        grid=grid,
        in_specs=[x_spec, w1s, b1s, w2s, b2s, w3s, b3s],
        out_specs=out_spec,
        compiler_params=pltpu.CompilerParams(
            dimension_semantics=("parallel",)),
    )(xp, w1p, b1p, w2p, b2p, w3p, b3p)

    # Slice the lane-dense padded output back to the logical shape.
    return out_pad[:batch, :output_size]


def init_linear_params(key, in_features, out_features):
    """Deterministic init mimicking nn.Linear (uniform +/- 1/sqrt(in)).

    Stored as (in, out) == PyTorch weight transposed, so the kernel does x @ W.
    """
    k_w, k_b = jax.random.split(key)
    bound = 1.0 / jnp.sqrt(jnp.float32(in_features))
    w = jax.random.uniform(k_w, (in_features, out_features), jnp.float32,
                           minval=-bound, maxval=bound)
    b = jax.random.uniform(k_b, (1, out_features), jnp.float32,
                           minval=-bound, maxval=bound)
    return w, b


if __name__ == "__main__":
    # NeuralNetwork(input_size=16, hidden_size=32, output_size=8), batch=4
    input_size, hidden_size, output_size = 16, 32, 8
    batch = 4

    key = jax.random.PRNGKey(0)
    k_x, k1, k2, k3 = jax.random.split(key, 4)

    x = jax.random.normal(k_x, (batch, input_size), jnp.float32)
    w1, b1 = init_linear_params(k1, input_size, hidden_size)
    w2, b2 = init_linear_params(k2, hidden_size, hidden_size)
    w3, b3 = init_linear_params(k3, hidden_size, output_size)

    # One-time parameter padding / bf16 cast (done in glue, not per call).
    w1p, b1p, w2p, b2p, w3p, b3p = prepare_params(w1, b1, w2, b2, w3, b3)

    out = neural_network_forward(x, w1p, b1p, w2p, b2p, w3p, b3p,
                                 output_size=output_size)
    out = jax.block_until_ready(out)

    # Pure-JAX f32 reference (kernel uses bf16 matmul inputs -> loose tol).
    ref = jnp.maximum(x @ w1 + b1, 0.0)
    ref = jnp.maximum(ref @ w2 + b2, 0.0)
    ref = ref @ w3 + b3
    assert out.shape == (batch, output_size)
    assert jnp.allclose(out, ref, atol=2e-2, rtol=2e-2), (
        f"max abs err {jnp.max(jnp.abs(out - ref))}")

    print("KERNEL_OK")
</pallas_src>

<mosaic_0001>
module attributes {stable_mosaic.version = 11 : i64} {
  func.func @mlp_kernel(%arg0: i32, %arg1: memref<128x128xbf16, #tpu.memory_space<vmem>>, %arg2: memref<128x128xbf16, #tpu.memory_space<vmem>>, %arg3: memref<1x128xf32, #tpu.memory_space<vmem>>, %arg4: memref<128x128xbf16, #tpu.memory_space<vmem>>, %arg5: memref<1x128xf32, #tpu.memory_space<vmem>>, %arg6: memref<128x128xbf16, #tpu.memory_space<vmem>>, %arg7: memref<1x128xf32, #tpu.memory_space<vmem>>, %arg8: memref<128x128xf32, #tpu.memory_space<vmem>>) attributes {dimension_semantics = [#tpu.dimension_semantics<parallel>], iteration_bounds = array<i64: 1>, scalar_prefetch = 0 : i64, scratch_operands = 0 : i64, tpu.core_type = #tpu.core_type<tc>, window_params = [{transform_indices = @transform_0, window_bounds = array<i64: 128, 128>}, {pipeline_mode = #tpu.pipeline_mode<synchronous>, transform_indices = @transform_1, window_bounds = array<i64: 128, 128>}, {pipeline_mode = #tpu.pipeline_mode<synchronous>, transform_indices = @transform_2, window_bounds = array<i64: 1, 128>}, {pipeline_mode = #tpu.pipeline_mode<synchronous>, transform_indices = @transform_3, window_bounds = array<i64: 128, 128>}, {pipeline_mode = #tpu.pipeline_mode<synchronous>, transform_indices = @transform_4, window_bounds = array<i64: 1, 128>}, {pipeline_mode = #tpu.pipeline_mode<synchronous>, transform_indices = @transform_5, window_bounds = array<i64: 128, 128>}, {pipeline_mode = #tpu.pipeline_mode<synchronous>, transform_indices = @transform_6, window_bounds = array<i64: 1, 128>}, {transform_indices = @transform_7, window_bounds = array<i64: 128, 128>}]} {
    %c0 = arith.constant 0 : index
    %c0_0 = arith.constant 0 : index
    %0 = vector.load %arg1[%c0, %c0_0] : memref<128x128xbf16, #tpu.memory_space<vmem>>, vector<128x128xbf16>
    %c0_1 = arith.constant 0 : index
    %c0_2 = arith.constant 0 : index
    %1 = vector.load %arg2[%c0_1, %c0_2] : memref<128x128xbf16, #tpu.memory_space<vmem>>, vector<128x128xbf16>
    %cst = arith.constant dense<0.000000e+00> : vector<128x128xf32>
    %2 = tpu.matmul %0, %1, %cst {dimension_numbers = #tpu.dot_dimension_numbers<[1], [0], [0], [1], [0, 0, 1, 1], [], []>} : vector<128x128xbf16>, vector<128x128xbf16>, vector<128x128xf32> -> vector<128x128xf32>
    %c0_3 = arith.constant 0 : index
    %c0_4 = arith.constant 0 : index
    %3 = vector.load %arg3[%c0_3, %c0_4] : memref<1x128xf32, #tpu.memory_space<vmem>>, vector<1x128xf32>
    %4 = vector.broadcast %3 : vector<1x128xf32> to vector<128x128xf32>
    %5 = arith.addf %2, %4 : vector<128x128xf32>
    %cst_5 = arith.constant 0.000000e+00 : f32
    %6 = vector.broadcast %cst_5 : f32 to vector<128x128xf32>
    %7 = arith.maximumf %5, %6 : vector<128x128xf32>
    %8 = arith.truncf %7 : vector<128x128xf32> to vector<128x128xbf16>
    %c0_6 = arith.constant 0 : index
    %c0_7 = arith.constant 0 : index
    %9 = vector.load %arg4[%c0_6, %c0_7] : memref<128x128xbf16, #tpu.memory_space<vmem>>, vector<128x128xbf16>
    %cst_8 = arith.constant dense<0.000000e+00> : vector<128x128xf32>
    %10 = tpu.matmul %8, %9, %cst_8 {dimension_numbers = #tpu.dot_dimension_numbers<[1], [0], [0], [1], [0, 0, 1, 1], [], []>} : vector<128x128xbf16>, vector<128x128xbf16>, vector<128x128xf32> -> vector<128x128xf32>
    %c0_9 = arith.constant 0 : index
    %c0_10 = arith.constant 0 : index
    %11 = vector.load %arg5[%c0_9, %c0_10] : memref<1x128xf32, #tpu.memory_space<vmem>>, vector<1x128xf32>
    %12 = vector.broadcast %11 : vector<1x128xf32> to vector<128x128xf32>
    %13 = arith.addf %10, %12 : vector<128x128xf32>
    %cst_11 = arith.constant 0.000000e+00 : f32
    %14 = vector.broadcast %cst_11 : f32 to vector<128x128xf32>
    %15 = arith.maximumf %13, %14 : vector<128x128xf32>
    %16 = arith.truncf %15 : vector<128x128xf32> to vector<128x128xbf16>
    %c0_12 = arith.constant 0 : index
    %c0_13 = arith.constant 0 : index
    %17 = vector.load %arg6[%c0_12, %c0_13] : memref<128x128xbf16, #tpu.memory_space<vmem>>, vector<128x128xbf16>
    %cst_14 = arith.constant dense<0.000000e+00> : vector<128x128xf32>
    %18 = tpu.matmul %16, %17, %cst_14 {dimension_numbers = #tpu.dot_dimension_numbers<[1], [0], [0], [1], [0, 0, 1, 1], [], []>} : vector<128x128xbf16>, vector<128x128xbf16>, vector<128x128xf32> -> vector<128x128xf32>
    %c0_15 = arith.constant 0 : index
    %c0_16 = arith.constant 0 : index
    %19 = vector.load %arg7[%c0_15, %c0_16] : memref<1x128xf32, #tpu.memory_space<vmem>>, vector<1x128xf32>
    %20 = vector.broadcast %19 : vector<1x128xf32> to vector<128x128xf32>
    %21 = arith.addf %18, %20 : vector<128x128xf32>
    %c0_17 = arith.constant 0 : index
    %c0_18 = arith.constant 0 : index
    %22 = vector.load %arg8[%c0_17, %c0_18] : memref<128x128xf32, #tpu.memory_space<vmem>>, vector<128x128xf32>
    tpu.vector_store %arg8[%c0_17, %c0_18], %21 {strides = array<i32>} : memref<128x128xf32, #tpu.memory_space<vmem>>, vector<128x128xf32>,
    return
  }
  func.func @transform_0(%arg0: i32) -> (i32, i32) {
    %c0_i32 = arith.constant 0 : i32
    %c0_i32_0 = arith.constant 0 : i32
    return %arg0, %c0_i32 : i32, i32
  }
  func.func @transform_1(%arg0: i32) -> (i32, i32) {
    %c0_i32 = arith.constant 0 : i32
    %c0_i32_0 = arith.constant 0 : i32
    %c0_i32_1 = arith.constant 0 : i32
    return %c0_i32, %c0_i32_0 : i32, i32
  }
  func.func @transform_2(%arg0: i32) -> (i32, i32) {
    %c0_i32 = arith.constant 0 : i32
    %c0_i32_0 = arith.constant 0 : i32
    %c0_i32_1 = arith.constant 0 : i32
    return %c0_i32, %c0_i32_0 : i32, i32
  }
  func.func @transform_3(%arg0: i32) -> (i32, i32) {
    %c0_i32 = arith.constant 0 : i32
    %c0_i32_0 = arith.constant 0 : i32
    %c0_i32_1 = arith.constant 0 : i32
    return %c0_i32, %c0_i32_0 : i32, i32
  }
  func.func @transform_4(%arg0: i32) -> (i32, i32) {
    %c0_i32 = arith.constant 0 : i32
    %c0_i32_0 = arith.constant 0 : i32
    %c0_i32_1 = arith.constant 0 : i32
    return %c0_i32, %c0_i32_0 : i32, i32
  }
  func.func @transform_5(%arg0: i32) -> (i32, i32) {
    %c0_i32 = arith.constant 0 : i32
    %c0_i32_0 = arith.constant 0 : i32
    %c0_i32_1 = arith.constant 0 : i32
    return %c0_i32, %c0_i32_0 : i32, i32
  }
  func.func @transform_6(%arg0: i32) -> (i32, i32) {
    %c0_i32 = arith.constant 0 : i32
    %c0_i32_0 = arith.constant 0 : i32
    %c0_i32_1 = arith.constant 0 : i32
    return %c0_i32, %c0_i32_0 : i32, i32
  }
  func.func @transform_7(%arg0: i32) -> (i32, i32) {
    %c0_i32 = arith.constant 0 : i32
    %c0_i32_0 = arith.constant 0 : i32
    return %arg0, %c0_i32 : i32, i32
  }
}

</mosaic_0001>

<bundles_post_ra>
// kernel: neural_network_forward.1
= control target key start
LH: loop header
LB: loop body
LE: loop exit
PB: predicated region body
PF: predicated region fallthrough
CT: control target
= control target key end

     0   :  { %12 = vsyncpa [#allocation3], 0  ;;  %s1181_s0 = inlined_call_operand.vmem [shape: bf16[128,128], index: 0, kind: input, shape index: {}]   ;;  %s1182_s1 = inlined_call_operand.vmem [shape: bf16[128,128], index: 1, kind: input, shape index: {}]   ;;  %s1183_s2 = inlined_call_operand.vmem [shape: f32[1,128], index: 2, kind: input, shape index: {}]   ;;  %s1184_s3 = inlined_call_operand.hbm [shape: bf16[128,128], index: 3, kind: input, shape index: {}]   ;;  %s1185_s4 = inlined_call_operand.vmem [shape: f32[1,128], index: 4, kind: input, shape index: {}]   ;;  %s1186_s5 = inlined_call_operand.hbm [shape: bf16[128,128], index: 5, kind: input, shape index: {}]   ;;  %s1187_s6 = inlined_call_operand.vmem [shape: f32[1,128], index: 6, kind: input, shape index: {}]   ;;  %s1188_s7 = inlined_call_operand.vmem [shape: f32[128,128], index: 7, kind: output, shape index: {}]  }
   0x1   :  { %13 = vsyncpa [#allocation5], 0  ;;  %s972_s24 = smov [#allocation2]   ;;  %s924_s28 = scalar_lea.hbm %s1184_s3, 1024 }
   0x2   :  { %s25_s25 = sshll.u32 %s972_s24, 4  ;;  %p925_p0 = scmp.ne.s32.totalorder %s1184_s3, %s924_s28  ;;  %s26_s25 = int_to_ptr.vmem [resolvable:$true] %s25_s25 }
   0x3   :  { %p928_p1 = scmp.lt.u32.totalorder %s924_s28, %s1184_s3 }
   0x5   :  { %p930_p2 = pnand %p928_p1, %p925_p0 }
   0x7   :  { %933 = shalt.err (!%p930_p2)
}
   0x8   :  { %s934_s10 = scalar_lea.vmem %s26_s25, 1024  ;;  %p939_p4 = scmp.lt.s32.totalorder %s26_s25, %s26_s25 }
   0x9   :  { %p935_p3 = scmp.ne.s32.totalorder %s26_s25, %s934_s10  ;;  %p940_p5 = scmp.lt.s32.totalorder %s934_s10, %s934_s10 }
   0xb   :  { %p941_p6 = por %p940_p5, %p939_p4 }
   0xd   :  { %p942_p7 = pnand %p941_p6, %p935_p3 }
   0xf   :  { %945 = shalt.err (!%p942_p7)
}
  0x10   :  { %s973_s11 = smov 64   ;;  %s974_s12 = smov 4  }
  0x11   :  { %31 = dma.hbm_to_vmem [thread:$0]  %s1184_s3, 1024, %s26_s25, [#allocation3], %s973_s11, %s973_s11, %s974_s12  }
  0x12   :  { %s975_s15 = smov [#allocation4]   ;;  %s946_s19 = scalar_lea.hbm %s1186_s5, 1024 }
  0x13   :  { %s39_s16 = sshll.u32 %s975_s15, 4  ;;  %p947_p8 = scmp.ne.s32.totalorder %s1186_s5, %s946_s19  ;;  %s40_s16 = int_to_ptr.vmem [resolvable:$true] %s39_s16 }
  0x14   :  { %p950_p9 = scmp.lt.u32.totalorder %s946_s19, %s1186_s5 }
  0x16   :  { %p952_p10 = pnand %p950_p9, %p947_p8 }
  0x18   :  { %955 = shalt.err (!%p952_p10)
}
  0x19   :  { %s956_s24 = scalar_lea.vmem %s40_s16, 1024  ;;  %p961_p12 = scmp.lt.s32.totalorder %s40_s16, %s40_s16 }
  0x1a   :  { %p957_p11 = scmp.ne.s32.totalorder %s40_s16, %s956_s24  ;;  %p962_p13 = scmp.lt.s32.totalorder %s956_s24, %s956_s24 }
  0x1c   :  { %p963_p0 = por %p962_p13, %p961_p12 }
  0x1e   :  { %p964_p1 = pnand %p963_p0, %p957_p11 }
  0x20   :  { %967 = shalt.err (!%p964_p1)
}
  0x21   :  { %45 = dma.hbm_to_vmem [thread:$0]  %s1186_s5, 1024, %s40_s16, [#allocation5], %s973_s11, %s973_s11, %s974_s12  }
  0x22   :  { %968 = dma.done.wait [#allocation3], 1024  }
  0x23   :  { %969 = vsyncadd [#allocation3], 4294966272 }
  0x24   :  { %970 = dma.done.wait [#allocation5], 1024  }
  0x25   :  { %971 = vsyncadd [#allocation5], 4294966272  ;;  %v892_v0 = vld [vmem:[%s1182_s1] sm:$0xff]   ;;  %v893_v1 = vld [vmem:[%s1182_s1 + $0x8] sm:$0xff]  }
  0x26   :  { %776 = vmatprep.subr.bf16.mxu0 %v892_v0  ;;  %v894_v2 = vld [vmem:[%s1182_s1 + $0x10] sm:$0xff]   ;;  %v895_v3 = vld [vmem:[%s1182_s1 + $0x18] sm:$0xff]   ;;  %v900_v4 = vld [vmem:[%s1181_s0] sm:$0xff]  }
  0x27   :  { %777 = vmatpush3.bf16.msra.mxu0 %v892_v0  ;;  %792 = vmatprep.mubr.bf16.mxu0 %v900_v4  ;;  %v896_v5 = vld [vmem:[%s1182_s1 + $0x20] sm:$0xff]   ;;  %v897_v6 = vld [vmem:[%s1182_s1 + $0x28] sm:$0xff]   ;;  %v898_v9 = vld [vmem:[%s1182_s1 + $0x30] sm:$0xff]  }
  0x28   :  { %778 = vmatprep.subr.bf16.mxu0 %v893_v1  ;;  %v908_v7 = vld [vmem:[#allocation2] sm:$0xff]   ;;  %v909_v8 = vld [vmem:[#allocation2 + $0x8] sm:$0xff]   ;;  %v910_v10 = vld [vmem:[#allocation2 + $0x10] sm:$0xff]  }
  0x29   :  { %808 = vmatprep.subr.bf16.mxu1 %v908_v7  ;;  %v899_v11 = vld [vmem:[%s1182_s1 + $0x38] sm:$0xff]   ;;  %v912_v13 = vld [vmem:[#allocation2 + $0x20] sm:$0xff]   ;;  %v901_v14 = vld [vmem:[%s1181_s0 + $0x8] sm:$0xff]  }
  0x2a   :  { %809 = vmatpush3.bf16.msra.mxu1 %v908_v7  ;;  %v911_v12 = vld [vmem:[#allocation2 + $0x18] sm:$0xff]   ;;  %v902_v15 = vld [vmem:[%s1181_s0 + $0x10] sm:$0xff]   ;;  %v913_v16 = vld [vmem:[#allocation2 + $0x28] sm:$0xff]  }
  0x2b   :  { %779 = vmatpush3.bf16.msra.mxu0 %v893_v1  ;;  %810 = vmatprep.subr.bf16.mxu1 %v909_v8  ;;  %v903_v17 = vld [vmem:[%s1181_s0 + $0x18] sm:$0xff]   ;;  %v904_v18 = vld [vmem:[%s1181_s0 + $0x20] sm:$0xff]   ;;  %v905_v19 = vld [vmem:[%s1181_s0 + $0x28] sm:$0xff]  }
  0x2c   :  { %780 = vmatprep.subr.bf16.mxu0 %v894_v2  ;;  %v906_v20 = vld [vmem:[%s1181_s0 + $0x30] sm:$0xff]   ;;  %v907_v21 = vld [vmem:[%s1181_s0 + $0x38] sm:$0xff]   ;;  %v916_v24 = vld [vmem:[#allocation4] sm:$0xff]  }
  0x2d   :  { %v914_v22 = vld [vmem:[#allocation2 + $0x30] sm:$0xff]   ;;  %v915_v23 = vld [vmem:[#allocation2 + $0x38] sm:$0xff]   ;;  %v917_v25 = vld [vmem:[#allocation4 + $0x8] sm:$0xff]  }
  0x2e   :  { %811 = vmatpush3.bf16.msra.mxu1 %v909_v8  ;;  %v918_v26 = vld [vmem:[#allocation4 + $0x10] sm:$0xff]   ;;  %v1088_v27 = vld [vmem:[#allocation4 + $0x18] sm:$0xff]   ;;  %v1091_v28 = vld [vmem:[#allocation4 + $0x20] sm:$0xff]  }
  0x2f   :  { %781 = vmatpush3.bf16.msra.mxu0 %v894_v2  ;;  %812 = vmatprep.subr.bf16.mxu1 %v910_v10  ;;  %v1095_v29 = vld [vmem:[#allocation4 + $0x28] sm:$0xff]   ;;  %v1103_v30 = vld [vmem:[%s1183_s2] ss:$0 sm:$0xff] }
  0x30   :  { %782 = vmatprep.subr.bf16.mxu0 %v895_v3 }
  0x32   :  { %813 = vmatpush3.bf16.msra.mxu1 %v910_v10 }
  0x33   :  { %783 = vmatpush3.bf16.msra.mxu0 %v895_v3  ;;  %814 = vmatprep.subr.bf16.mxu1 %v911_v12 }
  0x34   :  { %784 = vmatprep.subr.bf16.mxu0 %v896_v5 }
  0x36   :  { %815 = vmatpush3.bf16.msra.mxu1 %v911_v12 }
  0x37   :  { %785 = vmatpush3.bf16.msra.mxu0 %v896_v5  ;;  %816 = vmatprep.subr.bf16.mxu1 %v912_v13 }
  0x38   :  { %786 = vmatprep.subr.bf16.mxu0 %v897_v6 }
  0x3a   :  { %817 = vmatpush3.bf16.msra.mxu1 %v912_v13 }
  0x3b   :  { %787 = vmatpush3.bf16.msra.mxu0 %v897_v6  ;;  %818 = vmatprep.subr.bf16.mxu1 %v913_v16 }
  0x3c   :  { %788 = vmatprep.subr.bf16.mxu0 %v898_v9 }
  0x3e   :  { %819 = vmatpush3.bf16.msra.mxu1 %v913_v16 }
  0x3f   :  { %789 = vmatpush3.bf16.msra.mxu0 %v898_v9  ;;  %820 = vmatprep.subr.bf16.mxu1 %v914_v22 }
  0x40   :  { %790 = vmatprep.subr.bf16.mxu0 %v899_v11 }
  0x42   :  { %821 = vmatpush3.bf16.msra.mxu1 %v914_v22 }
  0x43   :  { %791 = vmatpush3.bf16.msra.mxu0 %v899_v11  ;;  %822 = vmatprep.subr.bf16.mxu1 %v915_v23 }
  0x44   :  { %840 = vmatprep.subr.bf16.mxu0 %v916_v24 }
  0x46   :  { %793 = vmatmul.mubr.bf16.vlgmr.msra.gmra.mrb[0].mxu0 %v901_v14  ;;  %823 = vmatpush3.bf16.msra.mxu1 %v915_v23  ;;  %v922_v23 = vld [vmem:[#allocation4 + $0x30] sm:$0xff]  }
  0x47   :  { %796 = vmatprep.mubr.bf16.mxu0 %v902_v15  ;;  %872 = vmatprep.subr.bf16.mxu1 %v916_v24 }
  0x48   :  { %841 = vmatpush3.bf16.msra.mxu0 %v916_v24 }
  0x49   :  { %842 = vmatprep.subr.bf16.mxu0 %v917_v25 }
  0x4c   :  { %843 = vmatpush3.bf16.msra.mxu0 %v917_v25 }
  0x4d   :  { %844 = vmatprep.subr.bf16.mxu0 %v918_v26 }
  0x4e   :  { %797 = vmatmul.mubr.bf16.gmra.mrb[4].mxu0 %v903_v17 }
  0x4f   :  { %800 = vmatprep.mubr.bf16.mxu0 %v904_v18 }
  0x50   :  { %845 = vmatpush3.bf16.msra.mxu0 %v918_v26 }
  0x51   :  { %846 = vmatprep.subr.bf16.mxu0 %v1088_v27 }
  0x54   :  { %847 = vmatpush3.bf16.msra.mxu0 %v1088_v27 }
  0x55   :  { %848 = vmatprep.subr.bf16.mxu0 %v1091_v28 }
  0x56   :  { %801 = vmatmul.mubr.bf16.gmra.mrb[8].mxu0 %v905_v19 }
  0x57   :  { %804 = vmatprep.mubr.bf16.mxu0 %v906_v20 }
  0x58   :  { %849 = vmatpush3.bf16.msra.mxu0 %v1091_v28 }
  0x59   :  { %850 = vmatprep.subr.bf16.mxu0 %v1095_v29 }
  0x5c   :  { %851 = vmatpush3.bf16.msra.mxu0 %v1095_v29 }
  0x5d   :  { %852 = vmatprep.subr.bf16.mxu0 %v922_v23 }
  0x5e   :  { %805 = vmatmul.mubr.bf16.gmra.mrb[12].mxu0 %v907_v21 }
  0x60   :  { %853 = vmatpush3.bf16.msra.mxu0 %v922_v23 }
 0x119   :  { %v794_v31 = vpop.f32.mrb[0].mxu0 }
 0x11a   :  { %v233_v32 = vadd.f32 %v794_v31, %v1103_v30  ;;  %v224_v33 = vpop.f32.mrb[1].mxu0 }
 0x11b   :  { %v225_v34 = vadd.f32 %v1103_v30, %v224_v33  ;;  %v795_v35 = vpop.f32.mrb[2].mxu0 }
 0x11c   :  { %v236_v36 = vadd.f32 %v795_v35, %v1103_v30  ;;  %v227_v37 = vpop.f32.mrb[3].mxu0  ;;  %v289_v39 = vmax.f32 %v233_v32, 0.0 }
 0x11d   :  { %v228_v38 = vadd.f32 %v1103_v30, %v227_v37  ;;  %v287_v41 = vmax.f32 %v225_v34, 0.0 }
 0x11e   :  { %v290_v40 = vmax.f32 %v236_v36, 0.0 }
 0x11f   :  { %v288_v42 = vmax.f32 %v228_v38, 0.0 }
 0x120   :  { %v304_v43 = vpack.c.bf16 %v290_v40, %v289_v39 }
 0x121   :  { %v798_v44 = vpop.f32.mrb[4].mxu0  ;;  %v303_v45 = vpack.c.bf16 %v288_v42, %v287_v41 }
 0x122   :  { %v249_v46 = vadd.f32 %v798_v44, %v1103_v30  ;;  %v240_v47 = vpop.f32.mrb[5].mxu0 }
 0x123   :  { %v241_v48 = vadd.f32 %v1103_v30, %v240_v47  ;;  %v799_v49 = vpop.f32.mrb[6].mxu0  ;;  %824 = vmatprep.mubr.bf16.mxu1 %v303_v45 }
 0x124   :  { %v252_v50 = vadd.f32 %v799_v49, %v1103_v30  ;;  %v243_v51 = vpop.f32.mrb[7].mxu0  ;;  %825 = vmatmul.mubr.bf16.vlgmr.msra.gmra.mrb[0].mxu1 %v304_v43  ;;  %v293_v53 = vmax.f32 %v249_v46, 0.0 }
 0x125   :  { %v244_v52 = vadd.f32 %v1103_v30, %v243_v51  ;;  %880 = vmatpush3.bf16.msra.mxu1 %v916_v24  ;;  %v291_v55 = vmax.f32 %v241_v48, 0.0  ;;  %v923_v24 = vld [vmem:[#allocation4 + $0x38] sm:$0xff]  }
 0x126   :  { %v294_v54 = vmax.f32 %v252_v50, 0.0  ;;  %873 = vmatprep.subr.bf16.mxu1 %v917_v25  ;;  %854 = vmatprep.subr.bf16.mxu0 %v923_v24 }
 0x127   :  { %v292_v56 = vmax.f32 %v244_v52, 0.0  ;;  %855 = vmatpush3.bf16.msra.mxu0 %v923_v24 }
 0x128   :  { %v306_v57 = vpack.c.bf16 %v294_v54, %v293_v53 }
 0x129   :  { %v305_v58 = vpack.c.bf16 %v292_v56, %v291_v55  ;;  %v802_v59 = vpop.f32.mrb[8].mxu0  ;;  %881 = vmatpush3.bf16.msra.mxu1 %v917_v25  ;;  %v710_v25 = vld [vmem:[%s1185_s4] ss:$0 sm:$0xff] }
 0x12a   :  { %v265_v60 = vadd.f32 %v802_v59, %v1103_v30  ;;  %v256_v61 = vpop.f32.mrb[9].mxu0  ;;  %874 = vmatprep.subr.bf16.mxu1 %v918_v26 }
 0x12b   :  { %v257_v62 = vadd.f32 %v1103_v30, %v256_v61  ;;  %v803_v63 = vpop.f32.mrb[10].mxu0  ;;  %828 = vmatprep.mubr.bf16.mxu1 %v305_v58 }
 0x12c   :  { %v268_v0 = vadd.f32 %v803_v63, %v1103_v30  ;;  %v259_v1 = vpop.f32.mrb[11].mxu0  ;;  %829 = vmatmul.mubr.bf16.gmra.mrb[4].mxu1 %v306_v57  ;;  %v297_v3 = vmax.f32 %v265_v60, 0.0 }
 0x12d   :  { %v260_v2 = vadd.f32 %v1103_v30, %v259_v1  ;;  %882 = vmatpush3.bf16.msra.mxu1 %v918_v26  ;;  %v295_v5 = vmax.f32 %v257_v62, 0.0 }
 0x12e   :  { %v298_v4 = vmax.f32 %v268_v0, 0.0  ;;  %875 = vmatprep.subr.bf16.mxu1 %v1088_v27 }
 0x12f   :  { %v296_v6 = vmax.f32 %v260_v2, 0.0 }
 0x130   :  { %v308_v7 = vpack.c.bf16 %v298_v4, %v297_v3 }
 0x131   :  { %v307_v8 = vpack.c.bf16 %v296_v6, %v295_v5  ;;  %v806_v9 = vpop.f32.mrb[12].mxu0  ;;  %883 = vmatpush3.bf16.msra.mxu1 %v1088_v27 }
 0x132   :  { %v281_v10 = vadd.f32 %v806_v9, %v1103_v30  ;;  %v272_v11 = vpop.f32.mrb[13].mxu0  ;;  %876 = vmatprep.subr.bf16.mxu1 %v1091_v28 }
 0x133   :  { %v273_v12 = vadd.f32 %v1103_v30, %v272_v11  ;;  %v807_v13 = vpop.f32.mrb[14].mxu0  ;;  %832 = vmatprep.mubr.bf16.mxu1 %v307_v8 }
 0x134   :  { %v284_v14 = vadd.f32 %v807_v13, %v1103_v30  ;;  %v275_v15 = vpop.f32.mrb[15].mxu0  ;;  %833 = vmatmul.mubr.bf16.gmra.mrb[8].mxu1 %v308_v7  ;;  %v301_v17 = vmax.f32 %v281_v10, 0.0 }
 0x135   :  { %v276_v16 = vadd.f32 %v1103_v30, %v275_v15  ;;  %884 = vmatpush3.bf16.msra.mxu1 %v1091_v28  ;;  %v299_v19 = vmax.f32 %v273_v12, 0.0 }
 0x136   :  { %v302_v18 = vmax.f32 %v284_v14, 0.0  ;;  %877 = vmatprep.subr.bf16.mxu1 %v1095_v29 }
 0x137   :  { %v300_v20 = vmax.f32 %v276_v16, 0.0 }
 0x138   :  { %v310_v21 = vpack.c.bf16 %v302_v18, %v301_v17  ;;  %v719_v18 = vld [vmem:[%s1187_s6] ss:$0 sm:$0xff] }
 0x139   :  { %v309_v22 = vpack.c.bf16 %v300_v20, %v299_v19  ;;  %885 = vmatpush3.bf16.msra.mxu1 %v1095_v29 }
 0x13a   :  { %878 = vmatprep.subr.bf16.mxu1 %v922_v23 }
 0x13b   :  { %836 = vmatprep.mubr.bf16.mxu1 %v309_v22 }
 0x13c   :  { %837 = vmatmul.mubr.bf16.gmra.mrb[12].mxu1 %v310_v21 }
 0x13d   :  { %886 = vmatpush3.bf16.msra.mxu1 %v922_v23 }
 0x13e   :  { %879 = vmatprep.subr.bf16.mxu1 %v923_v24 }
 0x141   :  { %887 = vmatpush3.bf16.msra.mxu1 %v923_v24 }
 0x1f7   :  { %v826_v26 = vpop.f32.mrb[0].mxu1 }
 0x1f8   :  { %v425_v27 = vadd.f32 %v826_v26, %v710_v25  ;;  %v416_v28 = vpop.f32.mrb[1].mxu1 }
 0x1f9   :  { %v417_v29 = vadd.f32 %v710_v25, %v416_v28  ;;  %v827_v30 = vpop.f32.mrb[2].mxu1 }
 0x1fa   :  { %v428_v31 = vadd.f32 %v827_v30, %v710_v25  ;;  %v419_v32 = vpop.f32.mrb[3].mxu1  ;;  %v481_v34 = vmax.f32 %v425_v27, 0.0 }
 0x1fb   :  { %v420_v33 = vadd.f32 %v710_v25, %v419_v32  ;;  %v479_v36 = vmax.f32 %v417_v29, 0.0 }
 0x1fc   :  { %v482_v35 = vmax.f32 %v428_v31, 0.0 }
 0x1fd   :  { %v480_v37 = vmax.f32 %v420_v33, 0.0 }
 0x1fe   :  { %v496_v38 = vpack.c.bf16 %v482_v35, %v481_v34 }
 0x1ff   :  { %v495_v39 = vpack.c.bf16 %v480_v37, %v479_v36  ;;  %v830_v40 = vpop.f32.mrb[4].mxu1 }
 0x200   :  { %v441_v41 = vadd.f32 %v830_v40, %v710_v25  ;;  %v432_v42 = vpop.f32.mrb[5].mxu1 }
 0x201   :  { %v433_v43 = vadd.f32 %v710_v25, %v432_v42  ;;  %v831_v44 = vpop.f32.mrb[6].mxu1  ;;  %856 = vmatprep.mubr.bf16.mxu0 %v495_v39 }
 0x202   :  { %v444_v45 = vadd.f32 %v831_v44, %v710_v25  ;;  %v435_v46 = vpop.f32.mrb[7].mxu1  ;;  %857 = vmatmul.mubr.bf16.vlgmr.msra.gmra.mrb[16].mxu0 %v496_v38  ;;  %v485_v48 = vmax.f32 %v441_v41, 0.0 }
 0x203   :  { %v436_v47 = vadd.f32 %v710_v25, %v435_v46  ;;  %v483_v50 = vmax.f32 %v433_v43, 0.0 }
 0x204   :  { %v486_v49 = vmax.f32 %v444_v45, 0.0 }
 0x205   :  { %v484_v51 = vmax.f32 %v436_v47, 0.0 }
 0x206   :  { %v498_v52 = vpack.c.bf16 %v486_v49, %v485_v48 }
 0x207   :  { %v497_v53 = vpack.c.bf16 %v484_v51, %v483_v50  ;;  %v834_v54 = vpop.f32.mrb[8].mxu1 }
 0x208   :  { %v457_v55 = vadd.f32 %v834_v54, %v710_v25  ;;  %v448_v56 = vpop.f32.mrb[9].mxu1 }
 0x209   :  { %v449_v57 = vadd.f32 %v710_v25, %v448_v56  ;;  %v835_v58 = vpop.f32.mrb[10].mxu1  ;;  %860 = vmatprep.mubr.bf16.mxu0 %v497_v53 }
 0x20a   :  { %v460_v59 = vadd.f32 %v835_v58, %v710_v25  ;;  %v451_v60 = vpop.f32.mrb[11].mxu1  ;;  %861 = vmatmul.mubr.bf16.gmra.mrb[20].mxu0 %v498_v52  ;;  %v489_v62 = vmax.f32 %v457_v55, 0.0 }
 0x20b   :  { %v452_v61 = vadd.f32 %v710_v25, %v451_v60  ;;  %v487_v0 = vmax.f32 %v449_v57, 0.0 }
 0x20c   :  { %v490_v63 = vmax.f32 %v460_v59, 0.0 }
 0x20d   :  { %v488_v1 = vmax.f32 %v452_v61, 0.0 }
 0x20e   :  { %v500_v2 = vpack.c.bf16 %v490_v63, %v489_v62 }
 0x20f   :  { %v499_v3 = vpack.c.bf16 %v488_v1, %v487_v0  ;;  %v838_v4 = vpop.f32.mrb[12].mxu1 }
 0x210   :  { %v473_v5 = vadd.f32 %v838_v4, %v710_v25  ;;  %v464_v6 = vpop.f32.mrb[13].mxu1 }
 0x211   :  { %v465_v7 = vadd.f32 %v710_v25, %v464_v6  ;;  %v839_v8 = vpop.f32.mrb[14].mxu1  ;;  %864 = vmatprep.mubr.bf16.mxu1 %v499_v3 }
 0x212   :  { %v476_v9 = vadd.f32 %v839_v8, %v710_v25  ;;  %v467_v10 = vpop.f32.mrb[15].mxu1  ;;  %865 = vmatmul.mubr.bf16.vlgmr.msra.gmra.mrb[16].mxu1 %v500_v2  ;;  %v493_v12 = vmax.f32 %v473_v5, 0.0 }
 0x213   :  { %v468_v11 = vadd.f32 %v710_v25, %v467_v10  ;;  %v491_v14 = vmax.f32 %v465_v7, 0.0 }
 0x214   :  { %v494_v13 = vmax.f32 %v476_v9, 0.0 }
 0x215   :  { %v492_v15 = vmax.f32 %v468_v11, 0.0 }
 0x216   :  { %v502_v16 = vpack.c.bf16 %v494_v13, %v493_v12 }
 0x217   :  { %v501_v17 = vpack.c.bf16 %v492_v15, %v491_v14 }
 0x219   :  { %868 = vmatprep.mubr.bf16.mxu1 %v501_v17 }
 0x21a   :  { %869 = vmatmul.mubr.bf16.gmra.mrb[20].mxu1 %v502_v16 }
 0x2d5   :  { %v858_v19 = vpop.f32.mrb[16].mxu0 }
 0x2d6   :  { %v617_v20 = vadd.f32 %v858_v19, %v719_v18  ;;  %v608_v21 = vpop.f32.mrb[17].mxu0 }
 0x2d7   :  { %v609_v22 = vadd.f32 %v719_v18, %v608_v21  ;;  %v859_v23 = vpop.f32.mrb[18].mxu0 }
 0x2d8   :  { %673 = vst [vmem:[%s1188_s7 + $0x10] sm:$0xff] %v617_v20  ;;  %v620_v24 = vadd.f32 %v859_v23, %v719_v18  ;;  %v611_v25 = vpop.f32.mrb[19].mxu0 }
 0x2d9   :  { %671 = vst [vmem:[%s1188_s7] sm:$0xff] %v609_v22  ;;  %v612_v26 = vadd.f32 %v719_v18, %v611_v25 }
 0x2da   :  { %674 = vst [vmem:[%s1188_s7 + $0x18] sm:$0xff] %v620_v24 }
 0x2db   :  { %672 = vst [vmem:[%s1188_s7 + $0x8] sm:$0xff] %v612_v26 }
 0x2dd   :  { %v862_v27 = vpop.f32.mrb[20].mxu0 }
 0x2de   :  { %v633_v28 = vadd.f32 %v862_v27, %v719_v18  ;;  %v624_v29 = vpop.f32.mrb[21].mxu0 }
 0x2df   :  { %v625_v30 = vadd.f32 %v719_v18, %v624_v29  ;;  %v863_v31 = vpop.f32.mrb[22].mxu0 }
 0x2e0   :  { %677 = vst [vmem:[%s1188_s7 + $0x30] sm:$0xff] %v633_v28  ;;  %v636_v32 = vadd.f32 %v863_v31, %v719_v18  ;;  %v627_v33 = vpop.f32.mrb[23].mxu0 }
 0x2e1   :  { %675 = vst [vmem:[%s1188_s7 + $0x20] sm:$0xff] %v625_v30  ;;  %v628_v34 = vadd.f32 %v719_v18, %v627_v33 }
 0x2e2   :  { %678 = vst [vmem:[%s1188_s7 + $0x38] sm:$0xff] %v636_v32 }
 0x2e3   :  { %676 = vst [vmem:[%s1188_s7 + $0x28] sm:$0xff] %v628_v34 }
 0x2e5   :  { %v866_v35 = vpop.f32.mrb[16].mxu1 }
 0x2e6   :  { %v649_v36 = vadd.f32 %v866_v35, %v719_v18  ;;  %v640_v37 = vpop.f32.mrb[17].mxu1 }
 0x2e7   :  { %v641_v38 = vadd.f32 %v719_v18, %v640_v37  ;;  %v867_v39 = vpop.f32.mrb[18].mxu1 }
 0x2e8   :  { %681 = vst [vmem:[%s1188_s7 + $0x50] sm:$0xff] %v649_v36  ;;  %v652_v40 = vadd.f32 %v867_v39, %v719_v18  ;;  %v643_v41 = vpop.f32.mrb[19].mxu1 }
 0x2e9   :  { %679 = vst [vmem:[%s1188_s7 + $0x40] sm:$0xff] %v641_v38  ;;  %v644_v42 = vadd.f32 %v719_v18, %v643_v41 }
 0x2ea   :  { %682 = vst [vmem:[%s1188_s7 + $0x58] sm:$0xff] %v652_v40 }
 0x2eb   :  { %680 = vst [vmem:[%s1188_s7 + $0x48] sm:$0xff] %v644_v42 }
 0x2ed   :  { %v870_v43 = vpop.f32.mrb[20].mxu1 }
 0x2ee   :  { %v665_v44 = vadd.f32 %v870_v43, %v719_v18  ;;  %v656_v45 = vpop.f32.mrb[21].mxu1 }
 0x2ef   :  { %v657_v46 = vadd.f32 %v719_v18, %v656_v45  ;;  %v871_v47 = vpop.f32.mrb[22].mxu1 }
 0x2f0   :  { %685 = vst [vmem:[%s1188_s7 + $0x70] sm:$0xff] %v665_v44  ;;  %v668_v48 = vadd.f32 %v871_v47, %v719_v18  ;;  %v659_v49 = vpop.f32.mrb[23].mxu1 }
 0x2f1   :  { %683 = vst [vmem:[%s1188_s7 + $0x60] sm:$0xff] %v657_v46  ;;  %v660_v50 = vadd.f32 %v719_v18, %v659_v49 }
 0x2f2   :  { %686 = vst [vmem:[%s1188_s7 + $0x78] sm:$0xff] %v668_v48 }
 0x2f3   :  { %684 = vst [vmem:[%s1188_s7 + $0x68] sm:$0xff] %v660_v50 }
 0x2f4   :  { %691 = vsyncpa [#allocation3], 1 }
 0x2f5   :  { %692 = vsyncpa [#allocation5], 1 }

</bundles_post_ra>
